<compile_context>
chip_gen: v7x
topology: tpu7x:2x2x1
jax: 0.10.0
libtpu: 0.0.40
codegen_flags: <defaults>
</compile_context>

<pallas_src>
import functools

import jax
import jax.numpy as jnp
from jax import lax
from jax.experimental import pallas as pl
from jax.experimental.pallas import tpu as pltpu


def _double_conv_kernel(x_ref, w1_ref, sb1_ref, w2_ref, sb2_ref, o_ref,
                        xs_ref, ys_ref):
    """Fused DoubleConv for one block of NB batch elements.

    x_ref:   (NB, H, W*Cin)          lane-dense input rows (channels minor)
    w1_ref:  (3*W*Cin, W*Cout)       dy-K-stacked banded row-conv weights
    sb1_ref: (2, W*Cout)             row 0: folded BN scale, row 1: folded bias
    w2_ref:  (3*W*Cout, W*Cout)
    sb2_ref: (2, W*Cout)
    o_ref:   (NB, H, W*Cout)         lane-dense output rows
    xs_ref:  VMEM (NB*H, 3*W*Cin)    staged conv1 operand (dy slabs in columns)
    ys_ref:  VMEM (NB*H, 3*W*Cout)   staged conv2 operand (intermediate never
                                     leaves VMEM)
    """
    NB, H, WCin = x_ref.shape
    WCout = o_ref.shape[-1]
    f32 = jnp.float32

    # ------- Stage conv1 operand: column slabs dy=0 (row above), dy=1
    # ------- (center), dy=2 (row below); out-of-image rows are zero (pad=1).
    for b in range(NB):                       # NB is a compile-time constant
        r0 = b * H
        x_b = x_ref[b]                                            # (H, WCin)
        xs_ref[r0:r0 + H, WCin:2 * WCin] = x_b                    # dy = 1
        xs_ref[r0 + 1:r0 + H, 0:WCin] = x_b[0:H - 1, :]           # dy = 0
        xs_ref[r0:r0 + 1, 0:WCin] = jnp.zeros((1, WCin), xs_ref.dtype)
        xs_ref[r0:r0 + H - 1, 2 * WCin:3 * WCin] = x_b[1:H, :]    # dy = 2
        xs_ref[r0 + H - 1:r0 + H, 2 * WCin:3 * WCin] = (
            jnp.zeros((1, WCin), xs_ref.dtype))

    # ------- Conv1: ONE K-stacked matmul + folded BN + ReLU -------
    y = jnp.dot(xs_ref[...], w1_ref[...], preferred_element_type=f32)
    y = jnp.maximum(y * sb1_ref[0:1, :] + sb1_ref[1:2, :], 0.0)   # (NB*H, WCout)

    # ------- Stage conv2 operand (layer fusion: y stays in VMEM) -------
    y_c = y.astype(ys_ref.dtype)
    for b in range(NB):
        r0 = b * H
        y_b = y_c[r0:r0 + H, :]
        ys_ref[r0:r0 + H, WCout:2 * WCout] = y_b                  # dy = 1
        ys_ref[r0 + 1:r0 + H, 0:WCout] = y_b[0:H - 1, :]          # dy = 0
        ys_ref[r0:r0 + 1, 0:WCout] = jnp.zeros((1, WCout), ys_ref.dtype)
        ys_ref[r0:r0 + H - 1, 2 * WCout:3 * WCout] = y_b[1:H, :]  # dy = 2
        ys_ref[r0 + H - 1:r0 + H, 2 * WCout:3 * WCout] = (
            jnp.zeros((1, WCout), ys_ref.dtype))

    # ------- Conv2: ONE K-stacked matmul + folded BN + ReLU -------
    z = jnp.dot(ys_ref[...], w2_ref[...], preferred_element_type=f32)
    z = jnp.maximum(z * sb2_ref[0:1, :] + sb2_ref[1:2, :], 0.0)

    o_ref[...] = z.reshape(NB, H, WCout).astype(o_ref.dtype)


def _build_kstacked_row_conv_weights(w_hwio, W):
    """HWIO (3,3,Cin,Cout) -> (3*W*Cin, W*Cout) dy-K-stacked banded weights.

    Row block dy occupies rows [dy*W*Cin, (dy+1)*W*Cin).  Within a block,
    row p*Cin+ci / col w*Cout+co holds K[dy, dx, ci, co] where p == w + dx - 1
    (summed over dx in {0,1,2}); out-of-range column taps are absent, which is
    exactly zero padding along W.
    """
    _, _, Cin, Cout = w_hwio.shape
    w_idx = jnp.arange(W)
    blocks = []
    for dy in range(3):
        m = jnp.zeros((W, Cin, W, Cout), w_hwio.dtype)
        for dx in range(3):
            sel = (w_idx[:, None] == (w_idx[None, :] + dx - 1))
            sel = sel.astype(w_hwio.dtype)                     # (W_src, W_dst)
            m = m + sel[:, None, :, None] * w_hwio[dy, dx][None, :, None, :]
        blocks.append(m.reshape(W * Cin, W * Cout))
    return jnp.concatenate(blocks, axis=0)


def fold_bn(gamma, beta, mean, var, eps=1e-5):
    scale = gamma / jnp.sqrt(var + eps)
    bias = beta - mean * scale
    return scale, bias


def prepare_double_conv_params(params, W, compute_dtype=jnp.float32):
    """One-time packing of PyTorch-style params into kernel form.

    Hoisted out of the per-call path (review: weight banding / BN folding /
    tiling cost rivals the kernel if done every forward call).
    Use compute_dtype=jnp.bfloat16 on v6e/v7x for bf16 MXU inputs (keep f32
    accumulation; relax verification tolerances to ~1e-2).
    """
    (w1, g1, b1, m1, v1, w2, g2, b2, m2, v2) = params
    w1k = _build_kstacked_row_conv_weights(w1.astype(jnp.float32), W)
    w2k = _build_kstacked_row_conv_weights(w2.astype(jnp.float32), W)
    s1, o1 = fold_bn(g1, b1, m1, v1)
    s2, o2 = fold_bn(g2, b2, m2, v2)
    sb1 = jnp.stack([jnp.tile(s1, W), jnp.tile(o1, W)]).astype(jnp.float32)
    sb2 = jnp.stack([jnp.tile(s2, W), jnp.tile(o2, W)]).astype(jnp.float32)
    return (w1k.astype(compute_dtype), sb1, w2k.astype(compute_dtype), sb2)


def _double_conv_pallas(x_rows, w1k, sb1, w2k, sb2, *, batch_block=1):
    """x_rows: (N, H, W*Cin) -> (N, H, W*Cout), lane-dense row layouts."""
    N, H, WCin = x_rows.shape
    WCout = w1k.shape[1]
    NB = batch_block
    assert N % NB == 0, (N, NB)

    grid_spec = pltpu.PrefetchScalarGridSpec(
        num_scalar_prefetch=0,
        grid=(N // NB,),
        in_specs=[
            pl.BlockSpec((NB, H, WCin), lambda n: (n, 0, 0)),
            pl.BlockSpec((3 * WCin, WCout), lambda n: (0, 0)),
            pl.BlockSpec((2, WCout), lambda n: (0, 0)),
            pl.BlockSpec((3 * WCout, WCout), lambda n: (0, 0)),
            pl.BlockSpec((2, WCout), lambda n: (0, 0)),
        ],
        out_specs=pl.BlockSpec((NB, H, WCout), lambda n: (n, 0, 0)),
        scratch_shapes=[
            pltpu.VMEM((NB * H, 3 * WCin), x_rows.dtype),   # conv1 operand
            pltpu.VMEM((NB * H, 3 * WCout), x_rows.dtype),  # conv2 operand
        ],
    )
    return pl.pallas_call(
        _double_conv_kernel,
        out_shape=jax.ShapeDtypeStruct((N, H, WCout), jnp.float32),
        grid_spec=grid_spec,
        compiler_params=pltpu.CompilerParams(
            dimension_semantics=("parallel",),   # batch blocks -> both v7x TCs
            vmem_limit_bytes=32 * 1024 * 1024,
        ),
    )(x_rows, w1k, sb1, w2k, sb2)


@functools.partial(jax.jit, static_argnames=("batch_block",))
def double_conv(x_nchw, packed_params, batch_block=1):
    """PyTorch-equivalent DoubleConv forward (eval-mode BN). NCHW in/out.

    batch_block: samples per grid step (matmul M = batch_block*H).  Keep the
    grid >= 2 blocks on v7x; set >1 on single-TC chips (v5e/v6e) to fill MXU.
    """
    w1k, sb1, w2k, sb2 = packed_params
    N, Cin, H, W = x_nchw.shape
    WCout = w1k.shape[1]
    Cout = WCout // W

    # Layout plumbing only (channels-minor, lane-dense rows). No jnp.pad.
    # TODO(synk): in a real model keep activations in NHWC-row layout
    #             end-to-end so this transpose is fused into the producer.
    x_rows = (jnp.transpose(x_nchw, (0, 2, 3, 1))
              .reshape(N, H, W * Cin).astype(w1k.dtype))

    y = _double_conv_pallas(x_rows, w1k, sb1, w2k, sb2,
                            batch_block=batch_block)        # (N, H, W*Cout)
    return jnp.transpose(y.reshape(N, H, W, Cout), (0, 3, 1, 2))


def reference_double_conv(x_nchw, params):
    """Pure-JAX reference (lax conv) for verification."""
    (w1, g1, b1, m1, v1, w2, g2, b2, m2, v2) = params

    def block(x, w_hwio, g, b, m, v):
        w_oihw = jnp.transpose(w_hwio, (3, 2, 0, 1))  # HWIO -> OIHW
        y = lax.conv_general_dilated(
            x, w_oihw, window_strides=(1, 1), padding=((1, 1), (1, 1)),
            dimension_numbers=('NCHW', 'OIHW', 'NCHW'))
        s, o = fold_bn(g, b, m, v)
        y = y * s[None, :, None, None] + o[None, :, None, None]
        return jnp.maximum(y, 0.0)

    y = block(x_nchw, w1, g1, b1, m1, v1)
    y = block(y, w2, g2, b2, m2, v2)
    return y


def make_params(key, in_channels, out_channels):
    ks = jax.random.split(key, 10)
    w1 = 0.1 * jax.random.normal(ks[0], (3, 3, in_channels, out_channels), jnp.float32)   # HWIO
    g1 = 1.0 + 0.05 * jax.random.normal(ks[1], (out_channels,), jnp.float32)
    b1 = 0.05 * jax.random.normal(ks[2], (out_channels,), jnp.float32)
    m1 = 0.05 * jax.random.normal(ks[3], (out_channels,), jnp.float32)
    v1 = 1.0 + 0.1 * jax.random.uniform(ks[4], (out_channels,), jnp.float32)
    w2 = 0.1 * jax.random.normal(ks[5], (3, 3, out_channels, out_channels), jnp.float32)  # HWIO
    g2 = 1.0 + 0.05 * jax.random.normal(ks[6], (out_channels,), jnp.float32)
    b2 = 0.05 * jax.random.normal(ks[7], (out_channels,), jnp.float32)
    m2 = 0.05 * jax.random.normal(ks[8], (out_channels,), jnp.float32)
    v2 = 1.0 + 0.1 * jax.random.uniform(ks[9], (out_channels,), jnp.float32)
    return (w1, g1, b1, m1, v1, w2, g2, b2, m2, v2)


if __name__ == "__main__":
    key = jax.random.PRNGKey(0)
    k_x, k_p = jax.random.split(key)

    N, Cin, Cout, H, W = 2, 4, 8, 16, 16
    x = jax.random.normal(k_x, (N, Cin, H, W), jnp.float32)   # NCHW like PyTorch
    params = make_params(k_p, Cin, Cout)

    # One-time parameter packing (NOT in the per-call path).
    packed = prepare_double_conv_params(params, W)            # f32 compute path

    out = jax.block_until_ready(double_conv(x, packed))

    ref = reference_double_conv(x, params)
    assert out.shape == (N, Cout, H, W), out.shape
    assert jnp.allclose(out, ref, atol=1e-4, rtol=1e-4), float(jnp.abs(out - ref).max())

    print("KERNEL_OK")
</pallas_src>

<mosaic_0001>
module attributes {stable_mosaic.version = 11 : i64} {
  func.func @_double_conv_kernel(%arg0: i32, %arg1: memref<1x16x64xf32, #tpu.memory_space<vmem>>, %arg2: memref<192x128xf32, #tpu.memory_space<vmem>>, %arg3: memref<2x128xf32, #tpu.memory_space<vmem>>, %arg4: memref<384x128xf32, #tpu.memory_space<vmem>>, %arg5: memref<2x128xf32, #tpu.memory_space<vmem>>, %arg6: memref<1x16x128xf32, #tpu.memory_space<vmem>>, %arg7: memref<16x192xf32, #tpu.memory_space<vmem>>, %arg8: memref<16x384xf32, #tpu.memory_space<vmem>>) attributes {dimension_semantics = [#tpu.dimension_semantics<parallel>], iteration_bounds = array<i64: 2>, scalar_prefetch = 0 : i64, scratch_operands = 2 : i64, tpu.core_type = #tpu.core_type<tc>, window_params = [{transform_indices = @transform_0, window_bounds = array<i64: 1, 16, 64>}, {pipeline_mode = #tpu.pipeline_mode<synchronous>, transform_indices = @transform_1, window_bounds = array<i64: 192, 128>}, {pipeline_mode = #tpu.pipeline_mode<synchronous>, transform_indices = @transform_2, window_bounds = array<i64: 2, 128>}, {pipeline_mode = #tpu.pipeline_mode<synchronous>, transform_indices = @transform_3, window_bounds = array<i64: 384, 128>}, {pipeline_mode = #tpu.pipeline_mode<synchronous>, transform_indices = @transform_4, window_bounds = array<i64: 2, 128>}, {transform_indices = @transform_5, window_bounds = array<i64: 1, 16, 128>}]} {
    %c0 = arith.constant 0 : index
    %c0_0 = arith.constant 0 : index
    %c0_1 = arith.constant 0 : index
    %0 = vector.load %arg1[%c0, %c0_0, %c0_1] : memref<1x16x64xf32, #tpu.memory_space<vmem>>, vector<1x16x64xf32>
    %1 = vector.shape_cast %0 : vector<1x16x64xf32> to vector<16x64xf32>
    %c0_2 = arith.constant 0 : index
    %c64 = arith.constant 64 : index
    %2 = vector.load %arg7[%c0_2, %c64] : memref<16x192xf32, #tpu.memory_space<vmem>>, vector<16x64xf32>
    tpu.vector_store %arg7[%c0_2, %c64], %1 {strides = array<i32>} : memref<16x192xf32, #tpu.memory_space<vmem>>, vector<16x64xf32>,
    %3 = vector.extract_strided_slice %1 {offsets = [0, 0], sizes = [15, 64], strides = [1, 1]} : vector<16x64xf32> to vector<15x64xf32>
    %c1 = arith.constant 1 : index
    %c0_3 = arith.constant 0 : index
    %4 = vector.load %arg7[%c1, %c0_3] : memref<16x192xf32, #tpu.memory_space<vmem>>, vector<15x64xf32>
    tpu.vector_store %arg7[%c1, %c0_3], %3 {strides = array<i32>} : memref<16x192xf32, #tpu.memory_space<vmem>>, vector<15x64xf32>,
    %cst = arith.constant 0.000000e+00 : f32
    %5 = vector.broadcast %cst : f32 to vector<1x64xf32>
    %c0_4 = arith.constant 0 : index
    %c0_5 = arith.constant 0 : index
    %6 = vector.load %arg7[%c0_4, %c0_5] : memref<16x192xf32, #tpu.memory_space<vmem>>, vector<1x64xf32>
    tpu.vector_store %arg7[%c0_4, %c0_5], %5 {strides = array<i32>} : memref<16x192xf32, #tpu.memory_space<vmem>>, vector<1x64xf32>,
    %7 = vector.extract_strided_slice %1 {offsets = [1, 0], sizes = [15, 64], strides = [1, 1]} : vector<16x64xf32> to vector<15x64xf32>
    %c0_6 = arith.constant 0 : index
    %c128 = arith.constant 128 : index
    %8 = vector.load %arg7[%c0_6, %c128] : memref<16x192xf32, #tpu.memory_space<vmem>>, vector<15x64xf32>
    tpu.vector_store %arg7[%c0_6, %c128], %7 {strides = array<i32>} : memref<16x192xf32, #tpu.memory_space<vmem>>, vector<15x64xf32>,
    %cst_7 = arith.constant 0.000000e+00 : f32
    %9 = vector.broadcast %cst_7 : f32 to vector<1x64xf32>
    %c15 = arith.constant 15 : index
    %c128_8 = arith.constant 128 : index
    %10 = vector.load %arg7[%c15, %c128_8] : memref<16x192xf32, #tpu.memory_space<vmem>>, vector<1x64xf32>
    tpu.vector_store %arg7[%c15, %c128_8], %9 {strides = array<i32>} : memref<16x192xf32, #tpu.memory_space<vmem>>, vector<1x64xf32>,
    %c0_9 = arith.constant 0 : index
    %c0_10 = arith.constant 0 : index
    %11 = vector.load %arg7[%c0_9, %c0_10] : memref<16x192xf32, #tpu.memory_space<vmem>>, vector<16x192xf32>
    %c0_11 = arith.constant 0 : index
    %c0_12 = arith.constant 0 : index
    %12 = vector.load %arg2[%c0_11, %c0_12] : memref<192x128xf32, #tpu.memory_space<vmem>>, vector<192x128xf32>
    %cst_13 = arith.constant dense<0.000000e+00> : vector<16x128xf32>
    %13 = tpu.matmul %11, %12, %cst_13 {dimension_numbers = #tpu.dot_dimension_numbers<[1], [0], [0], [1], [0, 0, 1, 1], [], []>} : vector<16x192xf32>, vector<192x128xf32>, vector<16x128xf32> -> vector<16x128xf32>
    %c0_14 = arith.constant 0 : index
    %c0_15 = arith.constant 0 : index
    %14 = vector.load %arg3[%c0_14, %c0_15] : memref<2x128xf32, #tpu.memory_space<vmem>>, vector<1x128xf32>
    %15 = vector.broadcast %14 : vector<1x128xf32> to vector<16x128xf32>
    %16 = arith.mulf %13, %15 : vector<16x128xf32>
    %c1_16 = arith.constant 1 : index
    %c0_17 = arith.constant 0 : index
    %17 = vector.load %arg3[%c1_16, %c0_17] : memref<2x128xf32, #tpu.memory_space<vmem>>, vector<1x128xf32>
    %18 = vector.broadcast %17 : vector<1x128xf32> to vector<16x128xf32>
    %19 = arith.addf %16, %18 : vector<16x128xf32>
    %cst_18 = arith.constant 0.000000e+00 : f32
    %20 = vector.broadcast %cst_18 : f32 to vector<16x128xf32>
    %21 = arith.maximumf %19, %20 : vector<16x128xf32>
    %c0_19 = arith.constant 0 : index
    %c128_20 = arith.constant 128 : index
    %22 = vector.load %arg8[%c0_19, %c128_20] : memref<16x384xf32, #tpu.memory_space<vmem>>, vector<16x128xf32>
    tpu.vector_store %arg8[%c0_19, %c128_20], %21 {strides = array<i32>} : memref<16x384xf32, #tpu.memory_space<vmem>>, vector<16x128xf32>,
    %23 = vector.extract_strided_slice %21 {offsets = [0, 0], sizes = [15, 128], strides = [1, 1]} : vector<16x128xf32> to vector<15x128xf32>
    %c1_21 = arith.constant 1 : index
    %c0_22 = arith.constant 0 : index
    %24 = vector.load %arg8[%c1_21, %c0_22] : memref<16x384xf32, #tpu.memory_space<vmem>>, vector<15x128xf32>
    tpu.vector_store %arg8[%c1_21, %c0_22], %23 {strides = array<i32>} : memref<16x384xf32, #tpu.memory_space<vmem>>, vector<15x128xf32>,
    %cst_23 = arith.constant 0.000000e+00 : f32
    %25 = vector.broadcast %cst_23 : f32 to vector<1x128xf32>
    %c0_24 = arith.constant 0 : index
    %c0_25 = arith.constant 0 : index
    %26 = vector.load %arg8[%c0_24, %c0_25] : memref<16x384xf32, #tpu.memory_space<vmem>>, vector<1x128xf32>
    tpu.vector_store %arg8[%c0_24, %c0_25], %25 {strides = array<i32>} : memref<16x384xf32, #tpu.memory_space<vmem>>, vector<1x128xf32>,
    %27 = vector.extract_strided_slice %21 {offsets = [1, 0], sizes = [15, 128], strides = [1, 1]} : vector<16x128xf32> to vector<15x128xf32>
    %c0_26 = arith.constant 0 : index
    %c256 = arith.constant 256 : index
    %28 = vector.load %arg8[%c0_26, %c256] : memref<16x384xf32, #tpu.memory_space<vmem>>, vector<15x128xf32>
    tpu.vector_store %arg8[%c0_26, %c256], %27 {strides = array<i32>} : memref<16x384xf32, #tpu.memory_space<vmem>>, vector<15x128xf32>,
    %cst_27 = arith.constant 0.000000e+00 : f32
    %29 = vector.broadcast %cst_27 : f32 to vector<1x128xf32>
    %c15_28 = arith.constant 15 : index
    %c256_29 = arith.constant 256 : index
    %30 = vector.load %arg8[%c15_28, %c256_29] : memref<16x384xf32, #tpu.memory_space<vmem>>, vector<1x128xf32>
    tpu.vector_store %arg8[%c15_28, %c256_29], %29 {strides = array<i32>} : memref<16x384xf32, #tpu.memory_space<vmem>>, vector<1x128xf32>,
    %c0_30 = arith.constant 0 : index
    %c0_31 = arith.constant 0 : index
    %31 = vector.load %arg8[%c0_30, %c0_31] : memref<16x384xf32, #tpu.memory_space<vmem>>, vector<16x384xf32>
    %c0_32 = arith.constant 0 : index
    %c0_33 = arith.constant 0 : index
    %32 = vector.load %arg4[%c0_32, %c0_33] : memref<384x128xf32, #tpu.memory_space<vmem>>, vector<384x128xf32>
    %cst_34 = arith.constant dense<0.000000e+00> : vector<16x128xf32>
    %33 = tpu.matmul %31, %32, %cst_34 {dimension_numbers = #tpu.dot_dimension_numbers<[1], [0], [0], [1], [0, 0, 1, 1], [], []>} : vector<16x384xf32>, vector<384x128xf32>, vector<16x128xf32> -> vector<16x128xf32>
    %c0_35 = arith.constant 0 : index
    %c0_36 = arith.constant 0 : index
    %34 = vector.load %arg5[%c0_35, %c0_36] : memref<2x128xf32, #tpu.memory_space<vmem>>, vector<1x128xf32>
    %35 = vector.broadcast %34 : vector<1x128xf32> to vector<16x128xf32>
    %36 = arith.mulf %33, %35 : vector<16x128xf32>
    %c1_37 = arith.constant 1 : index
    %c0_38 = arith.constant 0 : index
    %37 = vector.load %arg5[%c1_37, %c0_38] : memref<2x128xf32, #tpu.memory_space<vmem>>, vector<1x128xf32>
    %38 = vector.broadcast %37 : vector<1x128xf32> to vector<16x128xf32>
    %39 = arith.addf %36, %38 : vector<16x128xf32>
    %cst_39 = arith.constant 0.000000e+00 : f32
    %40 = vector.broadcast %cst_39 : f32 to vector<16x128xf32>
    %41 = arith.maximumf %39, %40 : vector<16x128xf32>
    %42 = vector.shape_cast %41 : vector<16x128xf32> to vector<1x16x128xf32>
    %c0_40 = arith.constant 0 : index
    %c0_41 = arith.constant 0 : index
    %c0_42 = arith.constant 0 : index
    %43 = vector.load %arg6[%c0_40, %c0_41, %c0_42] : memref<1x16x128xf32, #tpu.memory_space<vmem>>, vector<1x16x128xf32>
    tpu.vector_store %arg6[%c0_40, %c0_41, %c0_42], %42 {strides = array<i32>} : memref<1x16x128xf32, #tpu.memory_space<vmem>>, vector<1x16x128xf32>,
    return
  }
  func.func @transform_0(%arg0: i32) -> (i32, i32, i32) {
    %c0_i32 = arith.constant 0 : i32
    %c0_i32_0 = arith.constant 0 : i32
    %c0_i32_1 = arith.constant 0 : i32
    return %arg0, %c0_i32, %c0_i32_0 : i32, i32, i32
  }
  func.func @transform_1(%arg0: i32) -> (i32, i32) {
    %c0_i32 = arith.constant 0 : i32
    %c0_i32_0 = arith.constant 0 : i32
    %c0_i32_1 = arith.constant 0 : i32
    return %c0_i32, %c0_i32_0 : i32, i32
  }
  func.func @transform_2(%arg0: i32) -> (i32, i32) {
    %c0_i32 = arith.constant 0 : i32
    %c0_i32_0 = arith.constant 0 : i32
    %c0_i32_1 = arith.constant 0 : i32
    return %c0_i32, %c0_i32_0 : i32, i32
  }
  func.func @transform_3(%arg0: i32) -> (i32, i32) {
    %c0_i32 = arith.constant 0 : i32
    %c0_i32_0 = arith.constant 0 : i32
    %c0_i32_1 = arith.constant 0 : i32
    return %c0_i32, %c0_i32_0 : i32, i32
  }
  func.func @transform_4(%arg0: i32) -> (i32, i32) {
    %c0_i32 = arith.constant 0 : i32
    %c0_i32_0 = arith.constant 0 : i32
    %c0_i32_1 = arith.constant 0 : i32
    return %c0_i32, %c0_i32_0 : i32, i32
  }
  func.func @transform_5(%arg0: i32) -> (i32, i32, i32) {
    %c0_i32 = arith.constant 0 : i32
    %c0_i32_0 = arith.constant 0 : i32
    %c0_i32_1 = arith.constant 0 : i32
    return %arg0, %c0_i32, %c0_i32_0 : i32, i32, i32
  }
}

</mosaic_0001>

<bundles_post_ra>
// kernel: double_conv.1
= control target key start
LH: loop header
LB: loop body
LE: loop exit
PB: predicated region body
PF: predicated region fallthrough
CT: control target
= control target key end

     0   :  { %10 = vsyncpa [#allocation5], 0  ;;  %s1021_s18 = smov 0   ;;  %s1278_s0 = inlined_call_operand.vmem [shape: f32[2,16,64], index: 0, kind: input, shape index: {}]   ;;  %s1279_s1 = inlined_call_operand.hbm [shape: f32[192,128], index: 1, kind: input, shape index: {}]   ;;  %s1280_s2 = inlined_call_operand.vmem [shape: f32[2,128], index: 2, kind: input, shape index: {}]   ;;  %s1281_s3 = inlined_call_operand.vmem [shape: f32[384,128], index: 3, kind: input, shape index: {}]   ;;  %s1282_s4 = inlined_call_operand.vmem [shape: f32[2,128], index: 4, kind: input, shape index: {}]   ;;  %s1283_s5 = inlined_call_operand.vmem [shape: f32[2,16,128], index: 5, kind: output, shape index: {}]  }
   0x1 LB: > { %s1027_s19 = sadd.s32 4294967295, %s983_s18   ;;  %p711_p0 = scmp.ge.s32.totalorder %s983_s18, 1  ;;  %s983_s18 = sphi %s1021_s18, %s16_s18  }
   0x2   : > { %p157_p1 = scmp.lt.s32.totalorder %s983_s18, 3  ;;  %s985_s20 = smov [#allocation4]  }
   0x3   : > { %s169_s21 = sshll.u32 %s985_s20, 4  ;;  %p1284_p3 = scmp.eq.s32.totalorder %s1027_s19, 0  ;;  %s170_s21 = int_to_ptr.vmem [resolvable:$true] %s169_s21 }
   0x4   : > { %p1031_p2 = pnand %p711_p0, %p157_p1  ;;  %s945_s26 = scalar_lea.hbm %s1279_s1, 3072 }
   0x5   : > { %p946_p6 = scmp.ne.s32.totalorder %s1279_s1, %s945_s26  ;;  %p952_p10 = scmp.lt.u32.totalorder %s945_s26, %s1279_s1 }
   0x6   : > { %s1286_s22 = scalar_select %p1031_p2, 1, 0 }
   0x7   : > { %p925_p4 = pneg %p1031_p2 }
   0x9   : > { %p1040_p5 = pnand %p1284_p3, %p925_p4 }
   0xb   : > { %p947_p7 = pneg %p1040_p5 }
   0xd   : > { %p948_p8 = pnand %p947_p7, %p946_p6 }
   0xf   : > { %p949_p9 = pneg %p948_p8 }
  0x11   : > { %p954_p11 = pnand %p952_p10, %p949_p9 }
  0x13   : > { %957 = shalt.err (!%p954_p11)
}
  0x14   : > { %s958_s6 = scalar_lea.vmem %s170_s21, 3072  ;;  %p966_p1 = scmp.lt.s32.totalorder %s170_s21, %s170_s21 }
  0x15   : > { %p959_p12 = scmp.ne.s32.totalorder %s170_s21, %s958_s6  ;;  %p967_p4 = scmp.lt.s32.totalorder %s958_s6, %s958_s6 }
  0x17   : > { %p961_p13 = pnand %p959_p12, %p947_p7  ;;  %p968_p3 = por %p967_p4, %p966_p1 }
  0x19   : > { %p962_p0 = pneg %p961_p13 }
  0x1b   : > { %p969_p2 = pnand %p968_p3, %p962_p0 }
  0x1d   : > { %972 = shalt.err (!%p969_p2)
}
  0x1e   : > { %s986_s7 = smov 128   ;;  %s987_s8 = smov 8  }
  0x1f   : > { %928 = dma.hbm_to_vmem [thread:$0]  (!%p1040_p5), %s1279_s1, 3072, %s170_s21, [#allocation5], %s986_s7, %s986_s7, %s987_s8  }
  0x20   : > { %p1288_p6 = scmp.ne.s32.totalorder %s1286_s22, 0 }
  0x21   : > { %p1289_p8 = scmp.eq.s32.totalorder (!%p1288_p6), %s1027_s19, 0 }
  0x22   : > { %202 = sbr.rel (%p1288_p6) target bundleno = 655 (0x28f), region = 40 }
  0x29   : > { %978 = dma.done.wait (%p1289_p8), [#allocation5], 3072   ;;  %p1290_p7 = pmov %p1289_p8 }
  0x2a   : > { %p230_p2 = scmp.lt.s32.totalorder %s1027_s19, 1  ;;  %v988_v0 = vmov 0.0|0.0   ;;  %vm263_vm0 = vcmask 516096   ;;  %v989_v1 = vmov 0.0   ;;  %vm253_vm1 = vcmask 1040384   ;;  %v279_v4 = vld [vmem:[#allocation4] sm:$0xff] }
  0x2b   : > { %980 = vsyncadd (%p1290_p7), [#allocation5], 4294964224  ;;  %821 = vmatprep.subr.bf16.mxu0 %v988_v0  ;;  %274 = vst.msk [vmem:[#allocation2 + $0x1f] sm:$0x1] %vm263_vm0, %v989_v1  ;;  %vm265_vm2 = vcmask 1046528   ;;  %vm272_vm3 = vcmask 522240  }
  0x2c   : > { %s1292_s19 = smov (!%p230_p2, %s1027_s19), 1  ;;  %411 = vst [vmem:[#allocation3] sm:$0x1] %v989_v1  ;;  %419 = vst [vmem:[#allocation3 + $0x2f] sm:$0x1] %v989_v1  ;;  %vm261_vm4 = vcmask 523264  }
  0x2d   : > { %s728_s11 = sshll.u32 %s1292_s19, 4  ;;  %s990_s15 = smov 64   ;;  %v280_v9 = vld [vmem:[#allocation4 + $0x8] sm:$0xff]  ;;  %v281_v10 = vld [vmem:[#allocation4 + $0x10] sm:$0xff]  ;;  %v282_v12 = vld [vmem:[#allocation4 + $0x18] sm:$0xff]  ;;  %vm250_vm5 = vcmask 1048064  }
  0x2e   : > { %s234_s14 = scalar_lea.vmem %s1278_s0, %s728_s11  ;;  %v822_v11 = vpack.c.bf16 %v280_v9, %v279_v4  ;;  %v825_v15 = vpack.c.bf16 %v282_v12, %v281_v10  ;;  %v283_v16 = vld [vmem:[#allocation4 + $0x20] sm:$0xff]  ;;  %v284_v17 = vld [vmem:[#allocation4 + $0x28] sm:$0xff]  ;;  %v285_v19 = vld [vmem:[#allocation4 + $0x30] sm:$0xff]  ;;  %vm259_vm6 = vcmask 523265   ;;  %s239_s12 = scalar_lea.vmem %s1283_s5, %s728_s11 }
  0x2f   : > { %v1081_v2 = vld [vmem:[%s234_s14] sm:$0xff]  ;;  %v241_v3 = vld [vmem:[%s234_s14 + $0x8] sm:$0xff]  ;;  %v828_v18 = vpack.c.bf16 %v284_v17, %v283_v16  ;;  %v444_v26 = vld [vmem:[%s1281_s3 + $0x90] sm:$0xff] }
  0x30   : > { %244 = vrot.lane.b32.xlu0 %v1081_v2, %s990_s15  ;;  %v254_v5 = vrot.slane %v1081_v2, 7  ;;  %v266_v6 = vrot.slane %v1081_v2, 1  ;;  %v255_v7 = vrot.slane %v241_v3, 7  ;;  %v267_v8 = vrot.slane %v241_v3, 1  ;;  %823 = vmatpush1.bf16.msra.mxu0 %v822_v11  ;;  %v286_v20 = vld [vmem:[#allocation4 + $0x38] sm:$0xff]  ;;  %v442_v21 = vld [vmem:[%s1281_s3 + $0x80] sm:$0xff] }
  0x31   : > { %824 = vmatprep.subr.bf16.mxu0 %v988_v0  ;;  %v443_v22 = vld [vmem:[%s1281_s3 + $0x88] sm:$0xff]  ;;  %v426_v23 = vld [vmem:[%s1281_s3] sm:$0xff]  ;;  %v445_v29 = vld [vmem:[%s1281_s3 + $0x98] sm:$0xff]  ;;  %v831_v31 = vpack.c.bf16 %v286_v20, %v285_v19 }
  0x32   : > { %273 = vst.msk [vmem:[#allocation2 + $0x18] sm:$0x7f] %vm272_vm3, %v267_v8  ;;  %v1089_v13 = vsel %vm253_vm1, %v254_v5, %v255_v7  ;;  %v268_v14 = vsel %vm265_vm2, %v266_v6, %v267_v8  ;;  %v857_v24 = vpack.c.bf16 %v443_v22, %v442_v21  ;;  %v427_v25 = vld [vmem:[%s1281_s3 + $0x8] sm:$0xff]  ;;  %v428_v30 = vld [vmem:[%s1281_s3 + $0x10] sm:$0xff]  ;;  %v861_v32 = vpack.c.bf16 %v445_v29, %v444_v26  ;;  %v429_v33 = vld [vmem:[%s1281_s3 + $0x18] sm:$0xff] }
  0x33   : > { %271 = vst.msk [vmem:[#allocation2 + $0x8] sm:$0xff] %vm261_vm4, %v268_v14  ;;  %v859_v28 = vpack.c.bf16 %v427_v25, %v426_v23  ;;  %v446_v34 = vld [vmem:[%s1281_s3 + $0xa0] sm:$0xff]  ;;  %v447_v35 = vld [vmem:[%s1281_s3 + $0xa8] sm:$0xff]  ;;  %v287_v36 = vld [vmem:[#allocation4 + $0x40] sm:$0xff]  ;;  %v863_v38 = vpack.c.bf16 %v429_v33, %v428_v30 }
  0x34   : > { %246 = vrot.lane.b32.xlu0 %v241_v3, %s990_s15  ;;  %826 = vmatpush1.bf16.msra.mxu0 %v825_v15  ;;  %v288_v37 = vld [vmem:[#allocation4 + $0x48] sm:$0xff]  ;;  %v865_v39 = vpack.c.bf16 %v447_v35, %v446_v34  ;;  %v430_v40 = vld [vmem:[%s1281_s3 + $0x20] sm:$0xff]  ;;  %v431_v41 = vld [vmem:[%s1281_s3 + $0x28] sm:$0xff] }
  0x35   : > { %827 = vmatprep.subr.bf16.mxu0 %v988_v0  ;;  %858 = vmatprep.subr.bf16.mxu1 %v857_v24  ;;  %v834_v42 = vpack.c.bf16 %v288_v37, %v287_v36  ;;  %v448_v43 = vld [vmem:[%s1281_s3 + $0xb0] sm:$0xff]  ;;  %v449_v44 = vld [vmem:[%s1281_s3 + $0xb8] sm:$0xff]  ;;  %v289_v45 = vld [vmem:[#allocation4 + $0x50] sm:$0xff]  ;;  %v867_v47 = vpack.c.bf16 %v431_v41, %v430_v40 }
  0x36   : > { %860 = vmatpush3.bf16.msra.mxu1 %v859_v28  ;;  %v290_v46 = vld [vmem:[#allocation4 + $0x58] sm:$0xff]  ;;  %v869_v48 = vpack.c.bf16 %v449_v44, %v448_v43  ;;  %v432_v49 = vld [vmem:[%s1281_s3 + $0x30] sm:$0xff]  ;;  %v433_v50 = vld [vmem:[%s1281_s3 + $0x38] sm:$0xff] }
  0x37   : > { %862 = vmatprep.subr.bf16.mxu1 %v861_v32  ;;  %v837_v51 = vpack.c.bf16 %v290_v46, %v289_v45  ;;  %v291_v52 = vld [vmem:[#allocation4 + $0x60] sm:$0xff]  ;;  %v292_v53 = vld [vmem:[#allocation4 + $0x68] sm:$0xff]  ;;  %v871_v54 = vpack.c.bf16 %v433_v50, %v432_v49  ;;  %v293_v56 = vld [vmem:[#allocation4 + $0x70] sm:$0xff] }
  0x38   : > { %829 = vmatpush1.bf16.msra.mxu0 %v828_v18  ;;  %v840_v55 = vpack.c.bf16 %v292_v53, %v291_v52  ;;  %v294_v57 = vld [vmem:[#allocation4 + $0x78] sm:$0xff]  ;;  %v295_v59 = vld [vmem:[#allocation4 + $0x80] sm:$0xff]  ;;  %v296_v60 = vld [vmem:[#allocation4 + $0x88] sm:$0xff] }
  0x39   : > { %830 = vmatprep.subr.bf16.mxu0 %v988_v0  ;;  %v843_v58 = vpack.c.bf16 %v294_v57, %v293_v56  ;;  %v846_v61 = vpack.c.bf16 %v296_v60, %v295_v59  ;;  %v297_v62 = vld [vmem:[#allocation4 + $0x90] sm:$0xff]  ;;  %v298_v63 = vld [vmem:[#allocation4 + $0x98] sm:$0xff]  ;;  %v299_v4 = vld [vmem:[#allocation4 + $0xa0] sm:$0xff] }
  0x3a   : > { %v276_v27 = vld [vmem:[#allocation2 + $0x8] sm:$0xff]  ;;  %864 = vmatpush3.bf16.msra.mxu1 %v863_v38  ;;  %v849_v3 = vpack.c.bf16 %v298_v63, %v297_v62  ;;  %v300_v6 = vld [vmem:[#allocation4 + $0xa8] sm:$0xff]  ;;  %v301_v8 = vld [vmem:[#allocation4 + $0xb0] sm:$0xff] }
  0x3b   : > { %720 = vmatprep.mubr.msk.f32.mxu0 %vm261_vm4, %v276_v27  ;;  %866 = vmatprep.subr.bf16.mxu1 %v865_v39  ;;  %v852_v7 = vpack.c.bf16 %v300_v6, %v299_v4  ;;  %v302_v9 = vld [vmem:[#allocation4 + $0xb8] sm:$0xff]  ;;  %v278_v14 = vld [vmem:[#allocation2 + $0x18] sm:$0xff]  ;;  %v450_v2 = vld [vmem:[%s1281_s3 + $0xc0] sm:$0xff] }
  0x3c   : > { %832 = vmatpush1.bf16.msra.mxu0 %v831_v31  ;;  %v855_v10 = vpack.c.bf16 %v302_v9, %v301_v8  ;;  %v435_v16 = vld [vmem:[%s1281_s3 + $0x48] sm:$0xff]  ;;  %v452_v18 = vld [vmem:[%s1281_s3 + $0xd0] sm:$0xff]  ;;  %v453_v19 = vld [vmem:[%s1281_s3 + $0xd8] sm:$0xff] }
  0x3d   : > { %833 = vmatprep.subr.bf16.mxu0 %v988_v0  ;;  %v877_v20 = vpack.c.bf16 %v453_v19, %v452_v18  ;;  %v436_v21 = vld [vmem:[%s1281_s3 + $0x50] sm:$0xff]  ;;  %v437_v22 = vld [vmem:[%s1281_s3 + $0x58] sm:$0xff]  ;;  %v454_v24 = vld [vmem:[%s1281_s3 + $0xe0] sm:$0xff] }
  0x3e   : > { %868 = vmatpush3.bf16.msra.mxu1 %v867_v47  ;;  %v879_v23 = vpack.c.bf16 %v437_v22, %v436_v21  ;;  %v455_v25 = vld [vmem:[%s1281_s3 + $0xe8] sm:$0xff]  ;;  %v438_v27 = vld [vmem:[%s1281_s3 + $0x60] sm:$0xff]  ;;  %v456_v30 = vld [vmem:[%s1281_s3 + $0xf0] sm:$0xff] }
  0x3f   : > { %870 = vmatprep.subr.bf16.mxu1 %v869_v48  ;;  %v881_v26 = vpack.c.bf16 %v455_v25, %v454_v24  ;;  %v439_v28 = vld [vmem:[%s1281_s3 + $0x68] sm:$0xff]  ;;  %v457_v31 = vld [vmem:[%s1281_s3 + $0xf8] sm:$0xff]  ;;  %v440_v33 = vld [vmem:[%s1281_s3 + $0x70] sm:$0xff] }
  0x40   : > { %835 = vmatpush1.bf16.msra.mxu0 %v834_v42  ;;  %v883_v29 = vpack.c.bf16 %v439_v28, %v438_v27  ;;  %v885_v32 = vpack.c.bf16 %v457_v31, %v456_v30  ;;  %v441_v34 = vld [vmem:[%s1281_s3 + $0x78] sm:$0xff]  ;;  %v458_v36 = vld [vmem:[%s1281_s3 + $0x100] sm:$0xff]  ;;  %v459_v37 = vld [vmem:[%s1281_s3 + $0x108] sm:$0xff] }
  0x41   : > { %836 = vmatprep.subr.bf16.mxu0 %v988_v0  ;;  %v887_v35 = vpack.c.bf16 %v441_v34, %v440_v33  ;;  %v889_v38 = vpack.c.bf16 %v459_v37, %v458_v36  ;;  %v722_v39 = vld [vmem:[%s1280_s2] ss:$0 sm:$0xff]  ;;  %v723_v41 = vld [vmem:[%s1280_s2 + $0x1] ss:$0 sm:$0xff]  ;;  %v461_v56 = vld [vmem:[%s1281_s3 + $0x118] sm:$0xff] }
  0x42   : > { %872 = vmatpush3.bf16.msra.mxu1 %v871_v54  ;;  %v463_v62 = vld [vmem:[%s1281_s3 + $0x128] sm:$0xff]  ;;  %v465_v4 = vld [vmem:[%s1281_s3 + $0x138] sm:$0xff] }
  0x43   : > { %v467_v8 = vld [vmem:[%s1281_s3 + $0x148] sm:$0xff] }
  0x44   : > { %838 = vmatpush1.bf16.msra.mxu0 %v837_v51 }
  0x45   : > { %839 = vmatprep.subr.bf16.mxu0 %v988_v0 }
  0x48   : > { %841 = vmatpush1.bf16.msra.mxu0 %v840_v55  ;;  %v460_v55 = vld [vmem:[%s1281_s3 + $0x110] sm:$0xff] }
  0x49   : > { %842 = vmatprep.subr.bf16.mxu0 %v988_v0  ;;  %v893_v59 = vpack.c.bf16 %v461_v56, %v460_v55 }
  0x4c   : > { %844 = vmatpush1.bf16.msra.mxu0 %v843_v58 }
  0x4d   : > { %845 = vmatprep.subr.bf16.mxu0 %v988_v0 }
  0x50   : > { %847 = vmatpush1.bf16.msra.mxu0 %v846_v61  ;;  %v462_v61 = vld [vmem:[%s1281_s3 + $0x120] sm:$0xff] }
  0x51   : > { %848 = vmatprep.subr.bf16.mxu0 %v988_v0  ;;  %v897_v63 = vpack.c.bf16 %v463_v62, %v462_v61 }
  0x54   : > { %850 = vmatpush1.bf16.msra.mxu0 %v849_v3  ;;  %v464_v3 = vld [vmem:[%s1281_s3 + $0x130] sm:$0xff] }
  0x55   : > { %851 = vmatprep.subr.bf16.mxu0 %v988_v0  ;;  %v901_v6 = vpack.c.bf16 %v465_v4, %v464_v3 }
  0x58   : > { %853 = vmatpush1.bf16.msra.mxu0 %v852_v7  ;;  %v466_v7 = vld [vmem:[%s1281_s3 + $0x140] sm:$0xff] }
  0x59   : > { %854 = vmatprep.subr.bf16.mxu0 %v988_v0  ;;  %v905_v9 = vpack.c.bf16 %v467_v8, %v466_v7 }
  0x5c   : > { %856 = vmatpush1.bf16.msra.mxu0 %v855_v10  ;;  %v468_v10 = vld [vmem:[%s1281_s3 + $0x150] sm:$0xff] }
  0xa2   : > { %v245_v11 = vpop.permute.xlu0 %244 }
  0xa3   : > { %251 = vst.msk [vmem:[#allocation2] sm:$0xff] %vm250_vm5, %v245_v11  ;;  %v469_v11 = vld [vmem:[%s1281_s3 + $0x158] sm:$0xff] }
  0xa4   : > { %260 = vst.msk [vmem:[#allocation2] sm:$0xfe] %vm259_vm6, %v254_v5 }
  0xa5   : > { %264 = vst.msk [vmem:[#allocation2] sm:$0x1] %vm263_vm0, %v989_v1  ;;  %v451_v1 = vld [vmem:[%s1281_s3 + $0xc8] sm:$0xff] }
  0xa6   : > { %v247_v12 = vpop.permute.xlu0 %246  ;;  %v873_v5 = vpack.c.bf16 %v451_v1, %v450_v2  ;;  %v472_v2 = vld [vmem:[%s1281_s3 + $0x170] sm:$0xff]  ;;  %v473_v1 = vld [vmem:[%s1281_s3 + $0x178] sm:$0xff] }
  0xa7   : > { %252 = vst.msk [vmem:[#allocation2 + $0x10] sm:$0xff] %vm250_vm5, %v247_v12  ;;  %v909_v12 = vpack.c.bf16 %v469_v11, %v468_v10 }
  0xa8   : > { %262 = vst.msk [vmem:[#allocation2 + $0x10] sm:$0xff] %vm261_vm4, %v1089_v13  ;;  %v434_v13 = vld [vmem:[%s1281_s3 + $0x40] sm:$0xff]  ;;  %874 = vmatprep.subr.bf16.mxu1 %v873_v5  ;;  %v917_v5 = vpack.c.bf16 %v473_v1, %v472_v2 }
  0xa9   : > { %v875_v17 = vpack.c.bf16 %v435_v16, %v434_v13 }
  0xab   : > { %876 = vmatpush3.bf16.msra.mxu1 %v875_v17 }
  0xac   : > { %v275_v15 = vld [vmem:[#allocation2] sm:$0xff]  ;;  %878 = vmatprep.subr.bf16.mxu1 %v877_v20 }
  0xad   : > { %374 = vmatmul.mubr.f32.vlgmr.msra.gmra.mrb[0].mxu0 %v275_v15  ;;  %v471_v15 = vld [vmem:[%s1281_s3 + $0x168] sm:$0xff] }
  0xae   : > { %721 = vmatprep.mubr.msk.f32.mxu0 %vm261_vm4, %v278_v14  ;;  %v470_v14 = vld [vmem:[%s1281_s3 + $0x160] sm:$0xff] }
  0xaf   : > { %v277_v0 = vld [vmem:[#allocation2 + $0x10] sm:$0xff]  ;;  %880 = vmatpush3.bf16.msra.mxu1 %v879_v23  ;;  %v724_v23 = vld [vmem:[%s1282_s4] ss:$0 sm:$0xff] }
  0xb0   : > { %882 = vmatprep.subr.bf16.mxu1 %v881_v26  ;;  %v725_v26 = vld [vmem:[%s1282_s4 + $0x1] ss:$0 sm:$0xff] }
  0xb1   : > { %379 = vmatmul.mubr.f32.gmra.mrb[2].mxu0 %v277_v0  ;;  %v913_v0 = vpack.c.bf16 %v471_v15, %v470_v14 }
  0xb3   : > { %884 = vmatpush3.bf16.msra.mxu1 %v883_v29 }
  0xb4   : > { %886 = vmatprep.subr.bf16.mxu1 %v885_v32 }
  0xb7   : > { %888 = vmatpush3.bf16.msra.mxu1 %v887_v35 }
  0xb8   : > { %890 = vmatprep.subr.bf16.mxu1 %v889_v38 }
 0x180   : > { %v375_v40 = vpop.f32.mrb[0].mxu0 }
 0x181   : > { %v389_v42 = vmul.f32 %v722_v39, %v375_v40  ;;  %v377_v43 = vpop.f32.mrb[1].mxu0 }
 0x183   : > { %v396_v44 = vadd.f32 %v723_v41, %v389_v42 }
 0x184   : > { %v380_v45 = vpop.f32.mrb[2].mxu0 }
 0x185   : > { %v398_v46 = vmax.f32 %v396_v44, 0.0  ;;  %v390_v47 = vmul.f32 %v722_v39, %v380_v45  ;;  %v382_v48 = vpop.f32.mrb[3].mxu0 }
 0x187   : > { %v404_v49 = vrot.slane %v398_v46, 7  ;;  %v397_v50 = vadd.f32 %v723_v41, %v390_v47  ;;  %538 = vmatprep.mubr.f32.mxu1 %v398_v46  ;;  %v412_v52 = vrot.slane %v398_v46, 1 }
 0x189   : > { %409 = vst [vmem:[#allocation3] sm:$0xfe] %v404_v49  ;;  %v399_v51 = vmax.f32 %v397_v50, 0.0 }
 0x18b   : > { %v405_v53 = vrot.slane %v399_v51, 7  ;;  %v413_v54 = vrot.slane %v399_v51, 1 }
 0x18d   : > { %v406_v57 = vsel %vm253_vm1, %v404_v49, %v405_v53  ;;  %v414_v58 = vsel %vm265_vm2, %v412_v52, %v413_v54  ;;  %418 = vst [vmem:[#allocation3 + $0x28] sm:$0x7f] %v413_v54 }
 0x190   : > { %v420_v60 = vld [vmem:[#allocation3] sm:$0xff] }
 0x191   : > { %539 = vmatmul.mubr.f32.vlgmr.msra.gmra.mrb[0].mxu1 %v420_v60 }
 0x192   : > { %892 = vmatpush3.bf16.msra.mxu1 %v889_v38  ;;  %543 = vmatprep.mubr.f32.mxu1 %v399_v51 }
 0x193   : > { %894 = vmatprep.subr.bf16.mxu1 %v893_v59 }
 0x194   : > { %v425_v13 = vld [vmem:[#allocation3 + $0x28] sm:$0xff] }
 0x195   : > { %544 = vmatmul.mubr.f32.gmra.mrb[2].mxu1 %v406_v57 }
 0x196   : > { %896 = vmatpush3.bf16.msra.mxu1 %v893_v59  ;;  %818 = vmatprep.mubr.f32.mxu1 %v414_v58 }
 0x197   : > { %898 = vmatprep.subr.bf16.mxu1 %v897_v63 }
 0x19a   : > { %900 = vmatpush3.bf16.msra.mxu1 %v897_v63 }
 0x19b   : > { %902 = vmatprep.subr.bf16.mxu1 %v901_v6 }
 0x19e   : > { %904 = vmatpush3.bf16.msra.mxu1 %v901_v6 }
 0x19f   : > { %906 = vmatprep.subr.bf16.mxu1 %v905_v9 }
 0x1a2   : > { %908 = vmatpush3.bf16.msra.mxu1 %v905_v9 }
 0x1a3   : > { %910 = vmatprep.subr.bf16.mxu1 %v909_v12 }
 0x1a6   : > { %912 = vmatpush3.bf16.msra.mxu1 %v909_v12 }
 0x1a7   : > { %914 = vmatprep.subr.bf16.mxu1 %v913_v0 }
 0x1aa   : > { %916 = vmatpush3.bf16.msra.mxu1 %v913_v0 }
 0x1ab   : > { %918 = vmatprep.subr.bf16.mxu1 %v917_v5 }
 0x1ae   : > { %920 = vmatpush3.bf16.msra.mxu1 %v917_v5 }
 0x1b1   : > { %819 = vmatmul.mubr.f32.vlgmr.msra.gmra.mrb[4].mxu1 %v425_v13 }
 0x264   : > { %v762_v16 = vpop.f32.mrb[0].mxu1 }
 0x265   : > { %v763_v17 = vpop.f32.mrb[1].mxu1 }
 0x266   : > { %v764_v18 = vadd.f32 %v763_v17, %v762_v16 }
 0x268   : > { %v765_v19 = vpop.f32.mrb[2].mxu1 }
 0x269   : > { %v766_v20 = vpop.f32.mrb[3].mxu1 }
 0x26a   : > { %v767_v21 = vadd.f32 %v766_v20, %v765_v19 }
 0x284   : > { %v820_v22 = vpop.f32.mrb[4].mxu1 }
 0x285   : > { %v621_v24 = vadd.f32 %v820_v22, %v767_v21  ;;  %v615_v25 = vpop.f32.mrb[5].mxu1 }
 0x286   : > { %v616_v27 = vadd.f32 %v764_v18, %v615_v25 }
 0x287   : > { %v630_v28 = vmul.f32 %v724_v23, %v621_v24 }
 0x288   : > { %v629_v29 = vmul.f32 %v724_v23, %v616_v27 }
 0x289   : > { %v637_v30 = vadd.f32 %v725_v26, %v630_v28 }
 0x28a   : > { %v636_v31 = vadd.f32 %v725_v26, %v629_v29 }
 0x28b   : > { %v639_v32 = vmax.f32 %v637_v30, 0.0 }
 0x28c   : > { %v638_v33 = vmax.f32 %v636_v31, 0.0 }
 0x28d   : > { %641 = vst [vmem:[%s239_s12 + $0x8] sm:$0xff] %v639_v32 }
 0x28e   : > { %640 = vst [vmem:[%s239_s12] sm:$0xff] %v638_v33 }
 0x28f PF: > { %s16_s18 = sadd.s32 1, %s983_s18  }
 0x290   : > { %p13_p3 = scmp.ge.s32.totalorder %s16_s18, 4  }
 0x292   :  { %15 = sbr.rel (!%p13_p3) target bundleno = 1 (0x1), region = 75 }
 0x299   :  { %663 = vsyncpa [#allocation5], 1 }
 0x29a   :  { %665 = vsyncpa [#allocation5 + $0x1], 1 }

</bundles_post_ra>
